<compile_context>
chip_gen: v6e
topology: v6e:2x2x1
jax: 0.10.0
libtpu: 0.0.40
codegen_flags: <defaults>
</compile_context>

<pallas_src>
import math
import functools

import jax
import jax.numpy as jnp
from jax.experimental import pallas as pl
from jax.experimental.pallas import tpu as pltpu


def _dot_nt(a, b):
    """a: (m, d), b: (n, d) -> (m, n), contracting the last dim of both.

    Avoids materializing an explicit transpose of b (the MXU takes the
    transposed operand natively via dot_general dimension numbers)."""
    return jax.lax.dot_general(
        a, b, (((1,), (1,)), ((), ())), preferred_element_type=jnp.float32)


def _self_attention_kernel(q_ref, k_ref, v_ref, mask_ref,
                           wq_ref, bq_ref, wk_ref, bk_ref,
                           wv_ref, bv_ref, wf_ref, bf_ref,
                           o_ref,
                           kproj_ref, vproj_ref,
                           *, n_heads, head_dim):
    qi = pl.program_id(1)

    # ---- K/V projections: once per batch element, persisted in VMEM scratch.
    @pl.when(qi == 0)
    def _():
        k = k_ref[0]                                   # (S, H) bf16
        v = v_ref[0]                                   # (S, H) bf16
        k_p = jnp.dot(k, wk_ref[...],
                      preferred_element_type=jnp.float32) + bk_ref[...]
        v_p = jnp.dot(v, wv_ref[...],
                      preferred_element_type=jnp.float32) + bv_ref[...]
        kproj_ref[...] = k_p.astype(kproj_ref.dtype)   # bf16
        vproj_ref[...] = v_p.astype(vproj_ref.dtype)   # bf16

    # ---- Q projection for this query tile; fold 1/sqrt(d) into q once.
    q = q_ref[0]                                       # (tq, H) bf16
    q_p = jnp.dot(q, wq_ref[...],
                  preferred_element_type=jnp.float32) + bq_ref[...]
    q_p = q_p * (1.0 / math.sqrt(head_dim))
    q_p = q_p.astype(jnp.bfloat16)

    # ---- Additive mask bias, computed once per tile (hoisted out of loop).
    mask = mask_ref[0]                                 # (tq, S) f32
    neg_bias = jnp.where(mask == 0.0, -1e30, 0.0).astype(jnp.float32)

    tq = q_p.shape[0]
    hid = n_heads * head_dim
    out_acc = jnp.zeros((tq, hid), jnp.float32)

    # Per-head attention (static loop; n_heads small).  Head outputs are
    # folded straight into the fc accumulator -> no concatenate / relayout.
    for h in range(n_heads):
        lo = h * head_dim
        hi = lo + head_dim
        qh = q_p[:, lo:hi]                             # (tq, d) bf16
        kh = kproj_ref[:, lo:hi]                       # (S, d)  bf16
        vh = vproj_ref[:, lo:hi]                       # (S, d)  bf16

        energy = _dot_nt(qh, kh) + neg_bias            # (tq, S) f32

        # Softmax in f32 (v5e-safe), reciprocal on the EUP.
        m = jnp.max(energy, axis=-1, keepdims=True)
        p = jnp.exp(energy - m)
        denom = jnp.sum(p, axis=-1, keepdims=True)
        attn = (p * pl.reciprocal(denom, approx=True)).astype(jnp.bfloat16)

        ctx_h = jnp.dot(attn, vh,
                        preferred_element_type=jnp.float32)      # (tq, d) f32
        out_acc = out_acc + jnp.dot(ctx_h.astype(jnp.bfloat16),
                                    wf_ref[lo:hi, :],
                                    preferred_element_type=jnp.float32)

    o_ref[0] = (out_acc + bf_ref[...]).astype(o_ref.dtype)


def self_attention_pallas(query, key, value, mask, params, *, n_heads,
                          q_block=None):
    """query/key/value: (B, S, H); mask: (B, S, S) float32 (0 == masked)."""
    B, S, H = query.shape
    assert H % n_heads == 0
    head_dim = H // n_heads

    wq, bq, wk, bk, wv, bv, wf, bf = params            # w*: (H_in,H_out), b*: (1,H)

    # bf16 MXU operands (f32 accumulation in-kernel); biases stay f32.
    to_bf16 = lambda a: a.astype(jnp.bfloat16)
    q_bf, k_bf, v_bf = to_bf16(query), to_bf16(key), to_bf16(value)
    wq_bf, wk_bf, wv_bf, wf_bf = (to_bf16(wq), to_bf16(wk),
                                  to_bf16(wv), to_bf16(wf))

    if q_block is None:
        q_block = min(S, 128)
    num_q = pl.cdiv(S, q_block)

    kernel = functools.partial(_self_attention_kernel,
                               n_heads=n_heads, head_dim=head_dim)

    q_spec = pl.BlockSpec((1, q_block, H), lambda b, qi: (b, qi, 0))
    kv_spec = pl.BlockSpec((1, S, H), lambda b, qi: (b, 0, 0))
    mask_spec = pl.BlockSpec((1, q_block, S), lambda b, qi: (b, qi, 0))
    # Constant index_map -> keep a single resident copy (no double buffering).
    w_spec = pl.BlockSpec((H, H), lambda b, qi: (0, 0),
                          pipeline_mode=pl.Buffered(1))
    b_spec = pl.BlockSpec((1, H), lambda b, qi: (0, 0),
                          pipeline_mode=pl.Buffered(1))
    out_spec = pl.BlockSpec((1, q_block, H), lambda b, qi: (b, qi, 0))

    return pl.pallas_call(
        kernel,
        out_shape=jax.ShapeDtypeStruct((B, S, H), query.dtype),
        grid_spec=pltpu.PrefetchScalarGridSpec(
            num_scalar_prefetch=0,
            grid=(B, num_q),
            in_specs=[q_spec, kv_spec, kv_spec, mask_spec,
                      w_spec, b_spec, w_spec, b_spec,
                      w_spec, b_spec, w_spec, b_spec],
            out_specs=out_spec,
            scratch_shapes=[pltpu.VMEM((S, H), jnp.bfloat16),   # projected K
                            pltpu.VMEM((S, H), jnp.bfloat16)],  # projected V
        ),
        compiler_params=pltpu.CompilerParams(
            dimension_semantics=("parallel", "arbitrary")),
    )(q_bf, k_bf, v_bf, mask, wq_bf, bq, wk_bf, bk, wv_bf, bv, wf_bf, bf)


def _reference(query, key, value, mask, params, *, n_heads):
    """Plain-JAX reference mirroring the PyTorch forward (eval mode) with the
    same bf16-operand / f32-accumulation mixed precision as the kernel."""
    B, S, H = query.shape
    d = H // n_heads
    wq, bq, wk, bk, wv, bv, wf, bf = params
    bf16, f32 = jnp.bfloat16, jnp.float32

    def proj(x, w, b):
        return jnp.dot(x.astype(bf16), w.astype(bf16),
                       preferred_element_type=f32) + b[0]

    Q = (proj(query, wq, bq) / math.sqrt(d)).reshape(B, S, n_heads, d)
    K = proj(key, wk, bk).reshape(B, S, n_heads, d)
    V = proj(value, wv, bv).reshape(B, S, n_heads, d)
    Q = Q.transpose(0, 2, 1, 3).astype(bf16)
    K = K.transpose(0, 2, 1, 3).astype(bf16)
    V = V.transpose(0, 2, 1, 3).astype(bf16)

    energy = jnp.einsum("bhqd,bhkd->bhqk", Q, K, preferred_element_type=f32)
    energy = jnp.where(mask[:, None, :, :] == 0, -1e30, energy)
    attn = jax.nn.softmax(energy, axis=-1).astype(bf16)
    x = jnp.einsum("bhqk,bhkd->bhqd", attn, V, preferred_element_type=f32)
    x = x.transpose(0, 2, 1, 3).reshape(B, S, H)
    return jnp.dot(x.astype(bf16), wf.astype(bf16),
                   preferred_element_type=f32) + bf[0]


if __name__ == "__main__":
    # Small shapes consistent with the module: hid_dim=32, n_heads=4, seq=8, batch=2.
    B, S, H, N_HEADS = 2, 8, 32, 4

    key0 = jax.random.PRNGKey(0)
    keys = jax.random.split(key0, 12)

    def init_linear(kw, kb, fan_in):
        bound = 1.0 / math.sqrt(fan_in)
        w = jax.random.uniform(kw, (H, H), jnp.float32, -bound, bound)  # (in, out)
        b = jax.random.uniform(kb, (1, H), jnp.float32, -bound, bound)
        return w, b

    wq, bq = init_linear(keys[0], keys[1], H)
    wk, bk = init_linear(keys[2], keys[3], H)
    wv, bv = init_linear(keys[4], keys[5], H)
    wf, bf = init_linear(keys[6], keys[7], H)
    params = (wq, bq, wk, bk, wv, bv, wf, bf)

    query = jax.random.normal(keys[8], (B, S, H), jnp.float32)
    key_in = jax.random.normal(keys[9], (B, S, H), jnp.float32)
    value = jax.random.normal(keys[10], (B, S, H), jnp.float32)

    # Causal mask (1 = keep, 0 = masked), broadcast identically for both batches.
    causal = jnp.tril(jnp.ones((S, S), jnp.float32))
    mask = jnp.broadcast_to(causal, (B, S, S))

    out = self_attention_pallas(query, key_in, value, mask, params,
                                n_heads=N_HEADS)
    out = jax.block_until_ready(out)

    ref = _reference(query, key_in, value, mask, params, n_heads=N_HEADS)
    assert out.shape == (B, S, H)
    max_err = jnp.max(jnp.abs(out - ref))
    assert jnp.allclose(out, ref, atol=2e-2, rtol=2e-2), (
        f"mismatch vs reference (max abs err {max_err})")

    print("KERNEL_OK")
</pallas_src>

<mosaic_0001>
module attributes {stable_mosaic.version = 11 : i64} {
  func.func @_self_attention_kernel(%arg0: i32, %arg1: i32, %arg2: memref<1x8x32xbf16, #tpu.memory_space<vmem>>, %arg3: memref<1x8x32xbf16, #tpu.memory_space<vmem>>, %arg4: memref<1x8x32xbf16, #tpu.memory_space<vmem>>, %arg5: memref<1x8x8xf32, #tpu.memory_space<vmem>>, %arg6: memref<32x32xbf16, #tpu.memory_space<vmem>>, %arg7: memref<1x32xf32, #tpu.memory_space<vmem>>, %arg8: memref<32x32xbf16, #tpu.memory_space<vmem>>, %arg9: memref<1x32xf32, #tpu.memory_space<vmem>>, %arg10: memref<32x32xbf16, #tpu.memory_space<vmem>>, %arg11: memref<1x32xf32, #tpu.memory_space<vmem>>, %arg12: memref<32x32xbf16, #tpu.memory_space<vmem>>, %arg13: memref<1x32xf32, #tpu.memory_space<vmem>>, %arg14: memref<1x8x32xf32, #tpu.memory_space<vmem>>, %arg15: memref<8x32xbf16, #tpu.memory_space<vmem>>, %arg16: memref<8x32xbf16, #tpu.memory_space<vmem>>) attributes {dimension_semantics = [#tpu.dimension_semantics<parallel>, #tpu.dimension_semantics<arbitrary>], iteration_bounds = array<i64: 2, 1>, scalar_prefetch = 0 : i64, scratch_operands = 2 : i64, tpu.core_type = #tpu.core_type<tc>, window_params = [{transform_indices = @transform_0, window_bounds = array<i64: 1, 8, 32>}, {transform_indices = @transform_1, window_bounds = array<i64: 1, 8, 32>}, {transform_indices = @transform_2, window_bounds = array<i64: 1, 8, 32>}, {transform_indices = @transform_3, window_bounds = array<i64: 1, 8, 8>}, {pipeline_mode = #tpu.pipeline_mode<synchronous>, transform_indices = @transform_4, window_bounds = array<i64: 32, 32>}, {pipeline_mode = #tpu.pipeline_mode<synchronous>, transform_indices = @transform_5, window_bounds = array<i64: 1, 32>}, {pipeline_mode = #tpu.pipeline_mode<synchronous>, transform_indices = @transform_6, window_bounds = array<i64: 32, 32>}, {pipeline_mode = #tpu.pipeline_mode<synchronous>, transform_indices = @transform_7, window_bounds = array<i64: 1, 32>}, {pipeline_mode = #tpu.pipeline_mode<synchronous>, transform_indices = @transform_8, window_bounds = array<i64: 32, 32>}, {pipeline_mode = #tpu.pipeline_mode<synchronous>, transform_indices = @transform_9, window_bounds = array<i64: 1, 32>}, {pipeline_mode = #tpu.pipeline_mode<synchronous>, transform_indices = @transform_10, window_bounds = array<i64: 32, 32>}, {pipeline_mode = #tpu.pipeline_mode<synchronous>, transform_indices = @transform_11, window_bounds = array<i64: 1, 32>}, {transform_indices = @transform_12, window_bounds = array<i64: 1, 8, 32>}]} {
    %c0_i32 = arith.constant 0 : i32
    %0 = arith.cmpi eq, %arg1, %c0_i32 : i32
    %1 = arith.extui %0 : i1 to i32
    %c0_i32_0 = arith.constant 0 : i32
    %2 = arith.cmpi ne, %1, %c0_i32_0 : i32
    scf.if %2 {
      %c0_61 = arith.constant 0 : index
      %c0_62 = arith.constant 0 : index
      %c0_63 = arith.constant 0 : index
      %111 = vector.load %arg3[%c0_61, %c0_62, %c0_63] : memref<1x8x32xbf16, #tpu.memory_space<vmem>>, vector<1x8x32xbf16>
      %112 = vector.shape_cast %111 : vector<1x8x32xbf16> to vector<8x32xbf16>
      %c0_64 = arith.constant 0 : index
      %c0_65 = arith.constant 0 : index
      %c0_66 = arith.constant 0 : index
      %113 = vector.load %arg4[%c0_64, %c0_65, %c0_66] : memref<1x8x32xbf16, #tpu.memory_space<vmem>>, vector<1x8x32xbf16>
      %114 = vector.shape_cast %113 : vector<1x8x32xbf16> to vector<8x32xbf16>
      %c0_67 = arith.constant 0 : index
      %c0_68 = arith.constant 0 : index
      %115 = vector.load %arg8[%c0_67, %c0_68] : memref<32x32xbf16, #tpu.memory_space<vmem>>, vector<32x32xbf16>
      %cst_69 = arith.constant dense<0.000000e+00> : vector<8x32xf32>
      %116 = tpu.matmul %112, %115, %cst_69 {dimension_numbers = #tpu.dot_dimension_numbers<[1], [0], [0], [1], [0, 0, 1, 1], [], []>} : vector<8x32xbf16>, vector<32x32xbf16>, vector<8x32xf32> -> vector<8x32xf32>
      %c0_70 = arith.constant 0 : index
      %c0_71 = arith.constant 0 : index
      %117 = vector.load %arg9[%c0_70, %c0_71] : memref<1x32xf32, #tpu.memory_space<vmem>>, vector<1x32xf32>
      %118 = vector.broadcast %117 : vector<1x32xf32> to vector<8x32xf32>
      %119 = arith.addf %116, %118 : vector<8x32xf32>
      %c0_72 = arith.constant 0 : index
      %c0_73 = arith.constant 0 : index
      %120 = vector.load %arg10[%c0_72, %c0_73] : memref<32x32xbf16, #tpu.memory_space<vmem>>, vector<32x32xbf16>
      %cst_74 = arith.constant dense<0.000000e+00> : vector<8x32xf32>
      %121 = tpu.matmul %114, %120, %cst_74 {dimension_numbers = #tpu.dot_dimension_numbers<[1], [0], [0], [1], [0, 0, 1, 1], [], []>} : vector<8x32xbf16>, vector<32x32xbf16>, vector<8x32xf32> -> vector<8x32xf32>
      %c0_75 = arith.constant 0 : index
      %c0_76 = arith.constant 0 : index
      %122 = vector.load %arg11[%c0_75, %c0_76] : memref<1x32xf32, #tpu.memory_space<vmem>>, vector<1x32xf32>
      %123 = vector.broadcast %122 : vector<1x32xf32> to vector<8x32xf32>
      %124 = arith.addf %121, %123 : vector<8x32xf32>
      %125 = arith.truncf %119 : vector<8x32xf32> to vector<8x32xbf16>
      %c0_77 = arith.constant 0 : index
      %c0_78 = arith.constant 0 : index
      %126 = vector.load %arg15[%c0_77, %c0_78] : memref<8x32xbf16, #tpu.memory_space<vmem>>, vector<8x32xbf16>
      tpu.vector_store %arg15[%c0_77, %c0_78], %125 {strides = array<i32>} : memref<8x32xbf16, #tpu.memory_space<vmem>>, vector<8x32xbf16>,
      %127 = arith.truncf %124 : vector<8x32xf32> to vector<8x32xbf16>
      %c0_79 = arith.constant 0 : index
      %c0_80 = arith.constant 0 : index
      %128 = vector.load %arg16[%c0_79, %c0_80] : memref<8x32xbf16, #tpu.memory_space<vmem>>, vector<8x32xbf16>
      tpu.vector_store %arg16[%c0_79, %c0_80], %127 {strides = array<i32>} : memref<8x32xbf16, #tpu.memory_space<vmem>>, vector<8x32xbf16>,
    } else {
    }
    %c0 = arith.constant 0 : index
    %c0_1 = arith.constant 0 : index
    %c0_2 = arith.constant 0 : index
    %3 = vector.load %arg2[%c0, %c0_1, %c0_2] : memref<1x8x32xbf16, #tpu.memory_space<vmem>>, vector<1x8x32xbf16>
    %4 = vector.shape_cast %3 : vector<1x8x32xbf16> to vector<8x32xbf16>
    %c0_3 = arith.constant 0 : index
    %c0_4 = arith.constant 0 : index
    %5 = vector.load %arg6[%c0_3, %c0_4] : memref<32x32xbf16, #tpu.memory_space<vmem>>, vector<32x32xbf16>
    %cst = arith.constant dense<0.000000e+00> : vector<8x32xf32>
    %6 = tpu.matmul %4, %5, %cst {dimension_numbers = #tpu.dot_dimension_numbers<[1], [0], [0], [1], [0, 0, 1, 1], [], []>} : vector<8x32xbf16>, vector<32x32xbf16>, vector<8x32xf32> -> vector<8x32xf32>
    %c0_5 = arith.constant 0 : index
    %c0_6 = arith.constant 0 : index
    %7 = vector.load %arg7[%c0_5, %c0_6] : memref<1x32xf32, #tpu.memory_space<vmem>>, vector<1x32xf32>
    %8 = vector.broadcast %7 : vector<1x32xf32> to vector<8x32xf32>
    %9 = arith.addf %6, %8 : vector<8x32xf32>
    %cst_7 = arith.constant 0.353553385 : f32
    %10 = vector.broadcast %cst_7 : f32 to vector<8x32xf32>
    %11 = arith.mulf %9, %10 : vector<8x32xf32>
    %12 = arith.truncf %11 : vector<8x32xf32> to vector<8x32xbf16>
    %c0_8 = arith.constant 0 : index
    %c0_9 = arith.constant 0 : index
    %c0_10 = arith.constant 0 : index
    %13 = vector.load %arg5[%c0_8, %c0_9, %c0_10] : memref<1x8x8xf32, #tpu.memory_space<vmem>>, vector<1x8x8xf32>
    %14 = vector.shape_cast %13 : vector<1x8x8xf32> to vector<8x8xf32>
    %cst_11 = arith.constant 0.000000e+00 : f32
    %15 = vector.broadcast %cst_11 : f32 to vector<8x8xf32>
    %16 = arith.cmpf oeq, %14, %15 : vector<8x8xf32>
    %cst_12 = arith.constant -1.000000e+30 : f32
    %cst_13 = arith.constant 0.000000e+00 : f32
    %17 = vector.broadcast %cst_12 : f32 to vector<8x8xf32>
    %18 = vector.broadcast %cst_13 : f32 to vector<8x8xf32>
    %19 = arith.select %16, %17, %18 : vector<8x8xi1>, vector<8x8xf32>
    %cst_14 = arith.constant 0.000000e+00 : f32
    %20 = vector.broadcast %cst_14 : f32 to vector<8x32xf32>
    %21 = vector.extract_strided_slice %12 {offsets = [0, 0], sizes = [8, 8], strides = [1, 1]} : vector<8x32xbf16> to vector<8x8xbf16>
    %c0_15 = arith.constant 0 : index
    %c0_16 = arith.constant 0 : index
    %22 = vector.load %arg15[%c0_15, %c0_16] : memref<8x32xbf16, #tpu.memory_space<vmem>>, vector<8x8xbf16>
    %c0_17 = arith.constant 0 : index
    %c0_18 = arith.constant 0 : index
    %23 = vector.load %arg16[%c0_17, %c0_18] : memref<8x32xbf16, #tpu.memory_space<vmem>>, vector<8x8xbf16>
    %cst_19 = arith.constant dense<0.000000e+00> : vector<8x8xf32>
    %24 = tpu.matmul %21, %22, %cst_19 {dimension_numbers = #tpu.dot_dimension_numbers<[1], [1], [0], [0], [0, 0, 1, 0], [], []>} : vector<8x8xbf16>, vector<8x8xbf16>, vector<8x8xf32> -> vector<8x8xf32>
    %25 = arith.addf %24, %19 : vector<8x8xf32>
    %cst_20 = arith.constant dense<0xFF800000> : vector<8xf32>
    %26 = vector.multi_reduction <maximumf>, %25, %cst_20 [1] : vector<8x8xf32> to vector<8xf32>
    %27 = vector.shape_cast %26 : vector<8xf32> to vector<8x1xf32>
    %28 = vector.broadcast %27 : vector<8x1xf32> to vector<8x8xf32>
    %29 = arith.subf %25, %28 : vector<8x8xf32>
    %30 = math.exp %29 : vector<8x8xf32>
    %cst_21 = arith.constant dense<0.000000e+00> : vector<8xf32>
    %31 = vector.multi_reduction <add>, %30, %cst_21 [1] : vector<8x8xf32> to vector<8xf32>
    %32 = vector.shape_cast %31 : vector<8xf32> to vector<8x1xf32>
    %33 = tpu.reciprocal %32 {approx = true} : vector<8x1xf32> -> vector<8x1xf32>
    %34 = vector.broadcast %33 : vector<8x1xf32> to vector<8x8xf32>
    %35 = arith.mulf %30, %34 : vector<8x8xf32>
    %36 = arith.truncf %35 : vector<8x8xf32> to vector<8x8xbf16>
    %cst_22 = arith.constant dense<0.000000e+00> : vector<8x8xf32>
    %37 = tpu.matmul %36, %23, %cst_22 {dimension_numbers = #tpu.dot_dimension_numbers<[1], [0], [0], [1], [0, 0, 1, 1], [], []>} : vector<8x8xbf16>, vector<8x8xbf16>, vector<8x8xf32> -> vector<8x8xf32>
    %38 = arith.truncf %37 : vector<8x8xf32> to vector<8x8xbf16>
    %c0_23 = arith.constant 0 : index
    %c0_24 = arith.constant 0 : index
    %39 = vector.load %arg12[%c0_23, %c0_24] : memref<32x32xbf16, #tpu.memory_space<vmem>>, vector<8x32xbf16>
    %cst_25 = arith.constant dense<0.000000e+00> : vector<8x32xf32>
    %40 = tpu.matmul %38, %39, %cst_25 {dimension_numbers = #tpu.dot_dimension_numbers<[1], [0], [0], [1], [0, 0, 1, 1], [], []>} : vector<8x8xbf16>, vector<8x32xbf16>, vector<8x32xf32> -> vector<8x32xf32>
    %41 = arith.addf %20, %40 : vector<8x32xf32>
    %42 = vector.extract_strided_slice %12 {offsets = [0, 8], sizes = [8, 8], strides = [1, 1]} : vector<8x32xbf16> to vector<8x8xbf16>
    %c0_26 = arith.constant 0 : index
    %c8 = arith.constant 8 : index
    %43 = vector.load %arg15[%c0_26, %c8] : memref<8x32xbf16, #tpu.memory_space<vmem>>, vector<8x8xbf16>
    %c0_27 = arith.constant 0 : index
    %c8_28 = arith.constant 8 : index
    %44 = vector.load %arg16[%c0_27, %c8_28] : memref<8x32xbf16, #tpu.memory_space<vmem>>, vector<8x8xbf16>
    %cst_29 = arith.constant dense<0.000000e+00> : vector<8x8xf32>
    %45 = tpu.matmul %42, %43, %cst_29 {dimension_numbers = #tpu.dot_dimension_numbers<[1], [1], [0], [0], [0, 0, 1, 0], [], []>} : vector<8x8xbf16>, vector<8x8xbf16>, vector<8x8xf32> -> vector<8x8xf32>
    %46 = arith.addf %45, %19 : vector<8x8xf32>
    %cst_30 = arith.constant dense<0xFF800000> : vector<8xf32>
    %47 = vector.multi_reduction <maximumf>, %46, %cst_30 [1] : vector<8x8xf32> to vector<8xf32>
    %48 = vector.shape_cast %47 : vector<8xf32> to vector<8x1xf32>
    %49 = vector.broadcast %48 : vector<8x1xf32> to vector<8x8xf32>
    %50 = arith.subf %46, %49 : vector<8x8xf32>
    %51 = math.exp %50 : vector<8x8xf32>
    %cst_31 = arith.constant dense<0.000000e+00> : vector<8xf32>
    %52 = vector.multi_reduction <add>, %51, %cst_31 [1] : vector<8x8xf32> to vector<8xf32>
    %53 = vector.shape_cast %52 : vector<8xf32> to vector<8x1xf32>
    %54 = tpu.reciprocal %53 {approx = true} : vector<8x1xf32> -> vector<8x1xf32>
    %55 = vector.broadcast %54 : vector<8x1xf32> to vector<8x8xf32>
    %56 = arith.mulf %51, %55 : vector<8x8xf32>
    %57 = arith.truncf %56 : vector<8x8xf32> to vector<8x8xbf16>
    %cst_32 = arith.constant dense<0.000000e+00> : vector<8x8xf32>
    %58 = tpu.matmul %57, %44, %cst_32 {dimension_numbers = #tpu.dot_dimension_numbers<[1], [0], [0], [1], [0, 0, 1, 1], [], []>} : vector<8x8xbf16>, vector<8x8xbf16>, vector<8x8xf32> -> vector<8x8xf32>
    %59 = arith.truncf %58 : vector<8x8xf32> to vector<8x8xbf16>
    %c8_33 = arith.constant 8 : index
    %c0_34 = arith.constant 0 : index
    %60 = vector.load %arg12[%c8_33, %c0_34] : memref<32x32xbf16, #tpu.memory_space<vmem>>, vector<8x32xbf16>
    %cst_35 = arith.constant dense<0.000000e+00> : vector<8x32xf32>
    %61 = tpu.matmul %59, %60, %cst_35 {dimension_numbers = #tpu.dot_dimension_numbers<[1], [0], [0], [1], [0, 0, 1, 1], [], []>} : vector<8x8xbf16>, vector<8x32xbf16>, vector<8x32xf32> -> vector<8x32xf32>
    %62 = arith.addf %41, %61 : vector<8x32xf32>
    %63 = vector.extract_strided_slice %12 {offsets = [0, 16], sizes = [8, 8], strides = [1, 1]} : vector<8x32xbf16> to vector<8x8xbf16>
    %c0_36 = arith.constant 0 : index
    %c16 = arith.constant 16 : index
    %64 = vector.load %arg15[%c0_36, %c16] : memref<8x32xbf16, #tpu.memory_space<vmem>>, vector<8x8xbf16>
    %c0_37 = arith.constant 0 : index
    %c16_38 = arith.constant 16 : index
    %65 = vector.load %arg16[%c0_37, %c16_38] : memref<8x32xbf16, #tpu.memory_space<vmem>>, vector<8x8xbf16>
    %cst_39 = arith.constant dense<0.000000e+00> : vector<8x8xf32>
    %66 = tpu.matmul %63, %64, %cst_39 {dimension_numbers = #tpu.dot_dimension_numbers<[1], [1], [0], [0], [0, 0, 1, 0], [], []>} : vector<8x8xbf16>, vector<8x8xbf16>, vector<8x8xf32> -> vector<8x8xf32>
    %67 = arith.addf %66, %19 : vector<8x8xf32>
    %cst_40 = arith.constant dense<0xFF800000> : vector<8xf32>
    %68 = vector.multi_reduction <maximumf>, %67, %cst_40 [1] : vector<8x8xf32> to vector<8xf32>
    %69 = vector.shape_cast %68 : vector<8xf32> to vector<8x1xf32>
    %70 = vector.broadcast %69 : vector<8x1xf32> to vector<8x8xf32>
    %71 = arith.subf %67, %70 : vector<8x8xf32>
    %72 = math.exp %71 : vector<8x8xf32>
    %cst_41 = arith.constant dense<0.000000e+00> : vector<8xf32>
    %73 = vector.multi_reduction <add>, %72, %cst_41 [1] : vector<8x8xf32> to vector<8xf32>
    %74 = vector.shape_cast %73 : vector<8xf32> to vector<8x1xf32>
    %75 = tpu.reciprocal %74 {approx = true} : vector<8x1xf32> -> vector<8x1xf32>
    %76 = vector.broadcast %75 : vector<8x1xf32> to vector<8x8xf32>
    %77 = arith.mulf %72, %76 : vector<8x8xf32>
    %78 = arith.truncf %77 : vector<8x8xf32> to vector<8x8xbf16>
    %cst_42 = arith.constant dense<0.000000e+00> : vector<8x8xf32>
    %79 = tpu.matmul %78, %65, %cst_42 {dimension_numbers = #tpu.dot_dimension_numbers<[1], [0], [0], [1], [0, 0, 1, 1], [], []>} : vector<8x8xbf16>, vector<8x8xbf16>, vector<8x8xf32> -> vector<8x8xf32>
    %80 = arith.truncf %79 : vector<8x8xf32> to vector<8x8xbf16>
    %c16_43 = arith.constant 16 : index
    %c0_44 = arith.constant 0 : index
    %81 = vector.load %arg12[%c16_43, %c0_44] : memref<32x32xbf16, #tpu.memory_space<vmem>>, vector<8x32xbf16>
    %cst_45 = arith.constant dense<0.000000e+00> : vector<8x32xf32>
    %82 = tpu.matmul %80, %81, %cst_45 {dimension_numbers = #tpu.dot_dimension_numbers<[1], [0], [0], [1], [0, 0, 1, 1], [], []>} : vector<8x8xbf16>, vector<8x32xbf16>, vector<8x32xf32> -> vector<8x32xf32>
    %83 = arith.addf %62, %82 : vector<8x32xf32>
    %84 = vector.extract_strided_slice %12 {offsets = [0, 24], sizes = [8, 8], strides = [1, 1]} : vector<8x32xbf16> to vector<8x8xbf16>
    %c0_46 = arith.constant 0 : index
    %c24 = arith.constant 24 : index
    %85 = vector.load %arg15[%c0_46, %c24] : memref<8x32xbf16, #tpu.memory_space<vmem>>, vector<8x8xbf16>
    %c0_47 = arith.constant 0 : index
    %c24_48 = arith.constant 24 : index
    %86 = vector.load %arg16[%c0_47, %c24_48] : memref<8x32xbf16, #tpu.memory_space<vmem>>, vector<8x8xbf16>
    %cst_49 = arith.constant dense<0.000000e+00> : vector<8x8xf32>
    %87 = tpu.matmul %84, %85, %cst_49 {dimension_numbers = #tpu.dot_dimension_numbers<[1], [1], [0], [0], [0, 0, 1, 0], [], []>} : vector<8x8xbf16>, vector<8x8xbf16>, vector<8x8xf32> -> vector<8x8xf32>
    %88 = arith.addf %87, %19 : vector<8x8xf32>
    %cst_50 = arith.constant dense<0xFF800000> : vector<8xf32>
    %89 = vector.multi_reduction <maximumf>, %88, %cst_50 [1] : vector<8x8xf32> to vector<8xf32>
    %90 = vector.shape_cast %89 : vector<8xf32> to vector<8x1xf32>
    %91 = vector.broadcast %90 : vector<8x1xf32> to vector<8x8xf32>
    %92 = arith.subf %88, %91 : vector<8x8xf32>
    %93 = math.exp %92 : vector<8x8xf32>
    %cst_51 = arith.constant dense<0.000000e+00> : vector<8xf32>
    %94 = vector.multi_reduction <add>, %93, %cst_51 [1] : vector<8x8xf32> to vector<8xf32>
    %95 = vector.shape_cast %94 : vector<8xf32> to vector<8x1xf32>
    %96 = tpu.reciprocal %95 {approx = true} : vector<8x1xf32> -> vector<8x1xf32>
    %97 = vector.broadcast %96 : vector<8x1xf32> to vector<8x8xf32>
    %98 = arith.mulf %93, %97 : vector<8x8xf32>
    %99 = arith.truncf %98 : vector<8x8xf32> to vector<8x8xbf16>
    %cst_52 = arith.constant dense<0.000000e+00> : vector<8x8xf32>
    %100 = tpu.matmul %99, %86, %cst_52 {dimension_numbers = #tpu.dot_dimension_numbers<[1], [0], [0], [1], [0, 0, 1, 1], [], []>} : vector<8x8xbf16>, vector<8x8xbf16>, vector<8x8xf32> -> vector<8x8xf32>
    %101 = arith.truncf %100 : vector<8x8xf32> to vector<8x8xbf16>
    %c24_53 = arith.constant 24 : index
    %c0_54 = arith.constant 0 : index
    %102 = vector.load %arg12[%c24_53, %c0_54] : memref<32x32xbf16, #tpu.memory_space<vmem>>, vector<8x32xbf16>
    %cst_55 = arith.constant dense<0.000000e+00> : vector<8x32xf32>
    %103 = tpu.matmul %101, %102, %cst_55 {dimension_numbers = #tpu.dot_dimension_numbers<[1], [0], [0], [1], [0, 0, 1, 1], [], []>} : vector<8x8xbf16>, vector<8x32xbf16>, vector<8x32xf32> -> vector<8x32xf32>
    %104 = arith.addf %83, %103 : vector<8x32xf32>
    %c0_56 = arith.constant 0 : index
    %c0_57 = arith.constant 0 : index
    %105 = vector.load %arg13[%c0_56, %c0_57] : memref<1x32xf32, #tpu.memory_space<vmem>>, vector<1x32xf32>
    %106 = vector.broadcast %105 : vector<1x32xf32> to vector<8x32xf32>
    %107 = arith.addf %104, %106 : vector<8x32xf32>
    %c0_58 = arith.constant 0 : index
    %c0_59 = arith.constant 0 : index
    %c0_60 = arith.constant 0 : index
    %108 = vector.load %arg14[%c0_58, %c0_59, %c0_60] : memref<1x8x32xf32, #tpu.memory_space<vmem>>, vector<1x8x32xf32>
    %109 = vector.shape_cast %108 : vector<1x8x32xf32> to vector<8x32xf32>
    %110 = vector.shape_cast %107 : vector<8x32xf32> to vector<1x8x32xf32>
    tpu.vector_store %arg14[%c0_58, %c0_59, %c0_60], %110 {strides = array<i32>} : memref<1x8x32xf32, #tpu.memory_space<vmem>>, vector<1x8x32xf32>,
    return
  }
  func.func @transform_0(%arg0: i32, %arg1: i32) -> (i32, i32, i32) {
    %c0_i32 = arith.constant 0 : i32
    %c0_i32_0 = arith.constant 0 : i32
    return %arg0, %arg1, %c0_i32 : i32, i32, i32
  }
  func.func @transform_1(%arg0: i32, %arg1: i32) -> (i32, i32, i32) {
    %c0_i32 = arith.constant 0 : i32
    %c0_i32_0 = arith.constant 0 : i32
    %c0_i32_1 = arith.constant 0 : i32
    return %arg0, %c0_i32, %c0_i32_0 : i32, i32, i32
  }
  func.func @transform_2(%arg0: i32, %arg1: i32) -> (i32, i32, i32) {
    %c0_i32 = arith.constant 0 : i32
    %c0_i32_0 = arith.constant 0 : i32
    %c0_i32_1 = arith.constant 0 : i32
    return %arg0, %c0_i32, %c0_i32_0 : i32, i32, i32
  }
  func.func @transform_3(%arg0: i32, %arg1: i32) -> (i32, i32, i32) {
    %c0_i32 = arith.constant 0 : i32
    %c0_i32_0 = arith.constant 0 : i32
    return %arg0, %arg1, %c0_i32 : i32, i32, i32
  }
  func.func @transform_4(%arg0: i32, %arg1: i32) -> (i32, i32) {
    %c0_i32 = arith.constant 0 : i32
    %c0_i32_0 = arith.constant 0 : i32
    %c0_i32_1 = arith.constant 0 : i32
    return %c0_i32, %c0_i32_0 : i32, i32
  }
  func.func @transform_5(%arg0: i32, %arg1: i32) -> (i32, i32) {
    %c0_i32 = arith.constant 0 : i32
    %c0_i32_0 = arith.constant 0 : i32
    %c0_i32_1 = arith.constant 0 : i32
    return %c0_i32, %c0_i32_0 : i32, i32
  }
  func.func @transform_6(%arg0: i32, %arg1: i32) -> (i32, i32) {
    %c0_i32 = arith.constant 0 : i32
    %c0_i32_0 = arith.constant 0 : i32
    %c0_i32_1 = arith.constant 0 : i32
    return %c0_i32, %c0_i32_0 : i32, i32
  }
  func.func @transform_7(%arg0: i32, %arg1: i32) -> (i32, i32) {
    %c0_i32 = arith.constant 0 : i32
    %c0_i32_0 = arith.constant 0 : i32
    %c0_i32_1 = arith.constant 0 : i32
    return %c0_i32, %c0_i32_0 : i32, i32
  }
  func.func @transform_8(%arg0: i32, %arg1: i32) -> (i32, i32) {
    %c0_i32 = arith.constant 0 : i32
    %c0_i32_0 = arith.constant 0 : i32
    %c0_i32_1 = arith.constant 0 : i32
    return %c0_i32, %c0_i32_0 : i32, i32
  }
  func.func @transform_9(%arg0: i32, %arg1: i32) -> (i32, i32) {
    %c0_i32 = arith.constant 0 : i32
    %c0_i32_0 = arith.constant 0 : i32
    %c0_i32_1 = arith.constant 0 : i32
    return %c0_i32, %c0_i32_0 : i32, i32
  }
  func.func @transform_10(%arg0: i32, %arg1: i32) -> (i32, i32) {
    %c0_i32 = arith.constant 0 : i32
    %c0_i32_0 = arith.constant 0 : i32
    %c0_i32_1 = arith.constant 0 : i32
    return %c0_i32, %c0_i32_0 : i32, i32
  }
  func.func @transform_11(%arg0: i32, %arg1: i32) -> (i32, i32) {
    %c0_i32 = arith.constant 0 : i32
    %c0_i32_0 = arith.constant 0 : i32
    %c0_i32_1 = arith.constant 0 : i32
    return %c0_i32, %c0_i32_0 : i32, i32
  }
  func.func @transform_12(%arg0: i32, %arg1: i32) -> (i32, i32, i32) {
    %c0_i32 = arith.constant 0 : i32
    %c0_i32_0 = arith.constant 0 : i32
    return %arg0, %arg1, %c0_i32 : i32, i32, i32
  }
}

</mosaic_0001>

<bundles_post_ra>
// kernel: tpu_custom_call.1
= control target key start
LH: loop header
LB: loop body
LE: loop exit
PB: predicated region body
PF: predicated region fallthrough
CT: control target
= control target key end

     0   :  { %s2843_s0 = inlined_call_operand.hbm [shape: bf16[2,8,32], index: 0, kind: input, shape index: {}]   ;;  %s2844_s1 = inlined_call_operand.hbm [shape: bf16[2,8,32], index: 1, kind: input, shape index: {}]   ;;  %s2845_s2 = inlined_call_operand.hbm [shape: bf16[2,8,32], index: 2, kind: input, shape index: {}]   ;;  %s2846_s3 = inlined_call_operand.hbm [shape: f32[2,8,8], index: 3, kind: input, shape index: {}]   ;;  %s2847_s4 = inlined_call_operand.hbm [shape: bf16[32,32], index: 4, kind: input, shape index: {}]   ;;  %s2848_s5 = inlined_call_operand.vmem [shape: f32[1,32], index: 5, kind: input, shape index: {}]   ;;  %s2849_s6 = inlined_call_operand.hbm [shape: bf16[32,32], index: 6, kind: input, shape index: {}]   ;;  %s2850_s7 = inlined_call_operand.vmem [shape: f32[1,32], index: 7, kind: input, shape index: {}]   ;;  %s2851_s8 = inlined_call_operand.hbm [shape: bf16[32,32], index: 8, kind: input, shape index: {}]   ;;  %s2852_s9 = inlined_call_operand.hbm [shape: f32[1,32], index: 9, kind: input, shape index: {}]   ;;  %s2853_s10 = inlined_call_operand.vmem [shape: bf16[32,32], index: 10, kind: input, shape index: {}]   ;;  %s2854_s11 = inlined_call_operand.vmem [shape: f32[1,32], index: 11, kind: input, shape index: {}]   ;;  %s2855_s12 = inlined_call_operand.hbm [shape: f32[2,8,32], index: 12, kind: output, shape index: {}]  }
   0x1   :  { %2869 = sst [smem:[#allocation33_spill]] %s2843_s0 }
   0x2   :  { %2870 = sst [smem:[#allocation34_spill]] %s2844_s1 }
   0x3   :  { %2871 = sst [smem:[#allocation35_spill]] %s2847_s4 }
   0x4   :  { %2872 = sst [smem:[#allocation36_spill]] %s2849_s6 }
   0x5   :  { %2873 = sst [smem:[#allocation37_spill]] %s2854_s11 }
   0x6   :  { %2874 = sst [smem:[#allocation38_spill]] %s2855_s12 }
   0x7   :  { %17 = vsyncpa [#allocation5], 0 }
   0x8   :  { %19 = vsyncpa [#allocation5 + $0x1], 0 }
   0x9   :  { %20 = vsyncpa [#allocation8], 0 }
   0xa   :  { %22 = vsyncpa [#allocation8 + $0x1], 0 }
   0xb   :  { %23 = vsyncpa [#allocation11], 0 }
   0xc   :  { %25 = vsyncpa [#allocation11 + $0x1], 0 }
   0xd   :  { %26 = vsyncpa [#allocation14], 0 }
   0xe   :  { %27 = vsyncpa [#allocation17], 0 }
   0xf   :  { %28 = vsyncpa [#allocation6], 0 }
  0x10   :  { %30 = vsyncpa [#allocation6 + $0x1], 0  ;;  %s2413_s21 = smov 0   ;;  %s2415_s22 = smov 0  }
  0x11   :  { %s2417_s23 = smov 0   ;;  %s2419_s24 = smov 0  }
  0x12   :  { %s2421_s25 = smov 0   ;;  %s2423_s26 = smov 0  }
  0x13 LB: > { %2875 = sst [smem:[#allocation26_spill]] %s2310_s21  ;;  %s2444_s27 = sadd.s32 4294967295, %s2330_s26   ;;  %s2330_s26 = sphi %s2423_s26, %s36_s26   ;;  %s2326_s25 = sphi %s2421_s25, %s2920_s25   ;;  %s2322_s24 = sphi %s2419_s24, %s2919_s24   ;;  %s2318_s23 = sphi %s2417_s23, %s2915_s23   ;;  %s2314_s22 = sphi %s2415_s22, %s2918_s22   ;;  %s2310_s21 = sphi %s2413_s21, %s2917_s21  }
  0x14   : > { %2876 = sst [smem:[#allocation27_spill]] %s2318_s23  ;;  %s1680_s28 = sadd.s32 4294967294, %s2330_s26  }
  0x15   : > { %2877 = sst [smem:[#allocation28_spill]] %s2322_s24  ;;  %p70_p0 = scmp.ne.s32.totalorder %s2314_s22, %s2310_s21 }
  0x16   : > { %p2865_p1 = scmp.eq.s32.totalorder %s2444_s27, 0  ;;  %p344_p2 = scmp.eq.s32.totalorder %s2444_s27, 1 }
  0x17   : > { %p350_p3 = scmp.eq.s32.totalorder %s1680_s28, 1  ;;  %p1681_p5 = scmp.ge.s32.totalorder %s2330_s26, 1 }
  0x18   : > { %p2453_p4 = por %p2865_p1, %p70_p0  ;;  %p357_p7 = scmp.lt.s32.totalorder %s2330_s26, 3 }
  0x19   : > { %p2458_p6 = por %p350_p3, %p70_p0  ;;  %s2332_s14 = smov [#allocation12]  }
  0x1a   : > { %p2463_p8 = pnand %p1681_p5, %p357_p7  ;;  %s369_s15 = sshll.u32 %s2332_s14, 4  ;;  %s370_s15 = int_to_ptr.vmem [resolvable:$true] %s369_s15 }
  0x1b   : > { %s2879_s30 = scalar_select %p2458_p6, 1, 0 }
  0x1c   : > { %p1891_p9 = pneg %p2463_p8  ;;  %s2333_s17 = smov [#allocation13]  }
  0x1d   : > { %2880 = sst [smem:[#allocation29_spill]] %s2879_s30  ;;  %s385_s18 = sshll.u32 %s2333_s17, 4  ;;  %s386_s18 = int_to_ptr.vmem [resolvable:$true] %s385_s18 }
  0x1e   : > { %p2472_p11 = pnand %p1891_p9, %p2865_p1  ;;  %s2025_s19 = scalar_lea.vmem %s370_s15, 256 }
  0x1f   : > { %p2026_p13 = scmp.ne.s32.totalorder %s370_s15, %s2025_s19  ;;  %p2033_p5 = scmp.lt.s32.totalorder %s370_s15, %s370_s15 }
  0x20   : > { %p2866_p12 = pneg %p2472_p11  ;;  %p2034_p7 = scmp.lt.s32.totalorder %s2025_s19, %s2025_s19 }
  0x22   : > { %p2028_p0 = pnand %p2026_p13, %p2866_p12  ;;  %p2035_p10 = por %p2034_p7, %p2033_p5 }
  0x24   : > { %p2029_p3 = pneg %p2028_p0 }
  0x26   : > { %p2036_p9 = pnand %p2035_p10, %p2029_p3 }
  0x28   : > { %2039 = shalt.err (!%p2036_p9)
}
  0x29   : > { %s2858_s20 = smov 64   ;;  %s2859_s28 = smov 4  }
  0x2a   : > { %s2883_s4 = sld [smem:[#allocation35_spill]]  ;;  %s2051_s30 = scalar_lea.vmem %s386_s18, 256 }
  0x2b   : > { %p2052_p13 = scmp.ne.s32.totalorder %s386_s18, %s2051_s30  ;;  %p2059_p10 = scmp.lt.s32.totalorder %s386_s18, %s386_s18 }
  0x2c   : > { %p2060_p3 = scmp.lt.s32.totalorder %s2051_s30, %s2051_s30 }
  0x2d   : > { %p2054_p0 = pnand %p2052_p13, %p2866_p12 }
  0x2e   : > { %p2061_p7 = por %p2060_p3, %p2059_p10 }
  0x2f   : > { %p2055_p5 = pneg %p2054_p0 }
  0x30   : > { %1894 = dma.hbm_to_vmem [thread:$0]  (!%p2472_p11), %s2883_s4, 256, %s370_s15, [#allocation11], %s2858_s20, %s2858_s20, %s2859_s28  }
  0x31   : > { %p2062_p9 = pnand %p2061_p7, %p2055_p5 }
  0x33   : > { %2065 = shalt.err (!%p2062_p9)
}
  0x34   : > { %s2884_s6 = sld [smem:[#allocation36_spill]]  ;;  %s48_s30 = sadd.s32 1, %s2326_s25 }
  0x35   : > { %s57_s15 = sadd.s32 1, %s2318_s23  ;;  %p50_p13 = scmp.ge.s32.totalorder %s48_s30, 2 }
  0x36   : > { %p64_p0 = scmp.ne.s32.totalorder %s2318_s23, %s2314_s22  ;;  %p65_p5 = scmp.eq.s32.totalorder %s2330_s26, 0 }
  0x37   : > { %p1925_p10 = scmp.lt.s32.totalorder %s2330_s26, 2  ;;  %s2922_s30 = smov (%p50_p13, %s48_s30), 0 }
  0x38   : > { %2885 = sst [smem:[#allocation30_spill]] %s2922_s30  ;;  %p66_p3 = por %p65_p5, %p64_p0 }
  0x39   : > { %p2510_p7 = por %p344_p2, %p64_p0  ;;  %s52_s14 = ssub.s32 %s2326_s25, %s2922_s30 }
  0x3a   : > { %1897 = dma.hbm_to_vmem [thread:$0]  (!%p2472_p11), %s2884_s6, 256, %s386_s18, [#allocation14], %s2858_s20, %s2858_s20, %s2859_s28  }
  0x3b   : > { %s2886_s21 = scalar_select %p2510_p7, 1, 0 }
  0x3c   : > { %s2517_s18 = sand.u32 1, %s2318_s23   ;;  %p55_p9 = scmp.eq.s32.totalorder %s52_s14, 0 }
  0x3d   : > { %2887 = sst [smem:[#allocation31_spill]] %s2886_s21  ;;  %s2520_s17 = sshll.u32 %s2517_s18, 2 }
  0x3e   : > { %s2523_s19 = sshll.u32 %s2326_s25, 6  ;;  %p2525_p13 = pnand %p1925_p10, %p66_p3 }
  0x3f   : > { %s2530_s28 = scalar_select %p55_p9, %s2318_s23, %s57_s15  }
  0x40   : > { %s2867_s4 = sand.u32 1, %s2330_s26   ;;  %s2890_s1 = sld [smem:[#allocation34_spill]] }
  0x41   : > { %2889 = sst [smem:[#allocation32_spill]] %s2530_s28  ;;  %s455_s14 = scalar_lea.vmem [#allocation7], %s2520_s17 }
  0x42   : > { %s462_s21 = sshll.u32 %s455_s14, 4  ;;  %s2540_s11 = scalar_lea.sflag [#allocation8], %s2867_s4  ;;  %s463_s21 = int_to_ptr.vmem [resolvable:$true] %s462_s21 }
  0x43   : > { %p2868_p2 = pneg %p2525_p13  ;;  %s2079_s24 = scalar_lea.vmem %s463_s21, 64 }
  0x44   : > { %p2080_p0 = scmp.ne.s32.totalorder %s463_s21, %s2079_s24  ;;  %s2336_s15 = smov [#allocation7]  }
  0x45   : > { %s2084_s28 = sshll.u32 %s2336_s15, 4  ;;  %s2085_s28 = int_to_ptr.vmem [resolvable:$false] %s2084_s28 }
  0x46   : > { %s460_s12 = scalar_lea.hbm %s2890_s1, %s2523_s19  ;;  %p2082_p5 = pnand %p2080_p0, %p2868_p2 }
  0x47   : > { %s2086_s23 = scalar_lea.vmem %s2085_s28, 128  ;;  %p2087_p3 = scmp.lt.s32.totalorder %s463_s21, %s2085_s28 }
  0x48   : > { %p2083_p10 = pneg %p2082_p5  ;;  %p2088_p9 = scmp.lt.s32.totalorder %s2086_s23, %s2079_s24 }
  0x4a   : > { %p2089_p1 = por %p2088_p9, %p2087_p3 }
  0x4c   : > { %p2090_p12 = pnand %p2089_p1, %p2083_p10 }
  0x4e   : > { %2093 = shalt.err (!%p2090_p12)
}
  0x4f   : > { %1910 = dma.hbm_to_vmem [thread:$0]  (!%p2525_p13), %s460_s12, 64, %s463_s21, %s2540_s11  }
  0x50   : > { %s2337_s6 = smov [#allocation15]   ;;  %s2338_s14 = smov [#allocation16]  }
  0x51   : > { %s401_s30 = sshll.u32 %s2337_s6, 4  ;;  %s415_s4 = sshll.u32 %s2338_s14, 4  ;;  %s402_s30 = int_to_ptr.vmem [resolvable:$true] %s401_s30  ;;  %s416_s4 = int_to_ptr.vmem [resolvable:$true] %s415_s4 }
  0x52   : > { %s2105_s1 = scalar_lea.vmem %s402_s30, 256  ;;  %p2891_p5 = pneg %p2472_p11 }
  0x53   : > { %p2106_p0 = scmp.ne.s32.totalorder %s402_s30, %s2105_s1  ;;  %p2113_p3 = scmp.lt.s32.totalorder %s402_s30, %s402_s30 }
  0x54   : > { %p2114_p1 = scmp.lt.s32.totalorder %s2105_s1, %s2105_s1 }
  0x55   : > { %p2108_p2 = pnand %p2106_p0, %p2891_p5 }
  0x56   : > { %p2115_p12 = por %p2114_p1, %p2113_p3 }
  0x57   : > { %p2109_p6 = pneg %p2108_p2 }
  0x59   : > { %p2116_p10 = pnand %p2115_p12, %p2109_p6 }
  0x5b   : > { %2119 = shalt.err (!%p2116_p10)
}
  0x5c   : > { %s2892_s12 = smov 4   ;;  %s2893_s23 = smov 64  }
  0x5d   : > { %1900 = dma.hbm_to_vmem [thread:$0]  (!%p2472_p11), %s2851_s8, 256, %s402_s30, [#allocation14], %s2893_s23, %s2893_s23, %s2892_s12  }
  0x5e   : > { %s2131_s21 = scalar_lea.vmem %s416_s4, 16  ;;  %p2894_p0 = pmov %p2891_p5 }
  0x5f   : > { %p2132_p9 = scmp.ne.s32.totalorder %s416_s4, %s2131_s21  ;;  %s2138_s1 = scalar_lea.vmem %s416_s4, 32 }
  0x60   : > { %p2139_p3 = scmp.lt.s32.totalorder %s416_s4, %s416_s4  ;;  %p2140_p6 = scmp.lt.s32.totalorder %s2138_s1, %s2131_s21 }
  0x61   : > { %p2134_p2 = pnand %p2132_p9, %p2894_p0 }
  0x62   : > { %p2141_p1 = por %p2140_p6, %p2139_p3 }
  0x63   : > { %p2135_p5 = pneg %p2134_p2 }
  0x65   : > { %p2142_p12 = pnand %p2141_p1, %p2135_p5 }
  0x67   : > { %2145 = shalt.err (!%p2142_p12)
}
  0x68   : > { %1903 = dma.hbm_to_vmem [thread:$0]  (!%p2472_p11), %s2852_s9, 16, %s416_s4, [#allocation17]  }
  0x69   : > { %s2895_s0 = sld [smem:[#allocation33_spill]]  ;;  %s436_s23 = scalar_lea.vmem [#allocation4], %s2520_s17 }
  0x6a   : > { %s444_s24 = sshll.u32 %s436_s23, 4  ;;  %s433_s28 = scalar_lea.sflag [#allocation5], %s2517_s18  ;;  %s445_s24 = int_to_ptr.vmem [resolvable:$true] %s444_s24 }
  0x6b   : > { %s2159_s21 = scalar_lea.vmem %s445_s24, 64  ;;  %p2896_p9 = pneg %p2525_p13 }
  0x6c   : > { %p2160_p10 = scmp.ne.s32.totalorder %s445_s24, %s2159_s21  ;;  %s2339_s16 = smov [#allocation4]  }
  0x6d   : > { %s2164_s1 = sshll.u32 %s2339_s16, 4  ;;  %s2165_s1 = int_to_ptr.vmem [resolvable:$false] %s2164_s1 }
  0x6e   : > { %p2162_p0 = pnand %p2160_p10, %p2896_p9  ;;  %s2166_s15 = scalar_lea.vmem %s2165_s1, 128 }
  0x6f   : > { %s442_s12 = scalar_lea.hbm %s2895_s0, %s2523_s19  ;;  %p2167_p5 = scmp.lt.s32.totalorder %s445_s24, %s2165_s1 }
  0x70   : > { %p2163_p2 = pneg %p2162_p0  ;;  %p2168_p11 = scmp.lt.s32.totalorder %s2166_s15, %s2159_s21 }
  0x72   : > { %p2169_p3 = por %p2168_p11, %p2167_p5 }
  0x74   : > { %p2170_p6 = pnand %p2169_p3, %p2163_p2 }
  0x76   : > { %2173 = shalt.err (!%p2170_p6)
}
  0x77   : > { %1907 = dma.hbm_to_vmem [thread:$0]  (!%p2525_p13), %s442_s12, 64, %s445_s24, %s433_s28  }
  0x78   : > { %s478_s30 = scalar_lea.hbm %s2845_s2, %s2523_s19  ;;  %s473_s14 = scalar_lea.vmem [#allocation9], %s2520_s17 }
  0x79   : > { %s480_s23 = sshll.u32 %s473_s14, 4  ;;  %s1693_s16 = sshll.u32 %s2517_s18, 3  ;;  %s481_s23 = int_to_ptr.vmem [resolvable:$true] %s480_s23 }
  0x7a   : > { %s2187_s1 = scalar_lea.vmem %s481_s23, 64  ;;  %p2897_p12 = pmov %p2896_p9 }
  0x7b   : > { %p2188_p1 = scmp.ne.s32.totalorder %s481_s23, %s2187_s1  ;;  %s2340_s21 = smov [#allocation9]  }
  0x7c   : > { %s2192_s15 = sshll.u32 %s2340_s21, 4  ;;  %s2193_s15 = int_to_ptr.vmem [resolvable:$false] %s2192_s15 }
  0x7d   : > { %p2190_p10 = pnand %p2188_p1, %p2897_p12  ;;  %s2194_s0 = scalar_lea.vmem %s2193_s15, 128 }
  0x7e   : > { %p2195_p0 = scmp.lt.s32.totalorder %s481_s23, %s2193_s15  ;;  %p2196_p2 = scmp.lt.s32.totalorder %s2194_s0, %s2187_s1 }
  0x7f   : > { %p2191_p9 = pneg %p2190_p10 }
  0x80   : > { %p2197_p5 = por %p2196_p2, %p2195_p0 }
  0x82   : > { %p2198_p11 = pnand %p2197_p5, %p2191_p9 }
  0x84   : > { %2201 = shalt.err (!%p2198_p11)
}
  0x85   : > { %1913 = dma.hbm_to_vmem [thread:$0]  (!%p2525_p13), %s478_s30, 64, %s481_s23, %s2540_s11  }
  0x86   : > { %s1694_s18 = sshll.u32 %s2326_s25, 7  ;;  %s491_s24 = scalar_lea.vmem [#allocation10], %s1693_s16 }
  0x87   : > { %s497_s12 = scalar_lea.hbm %s2846_s3, %s1694_s18  ;;  %s499_s28 = sshll.u32 %s491_s24, 4  ;;  %s500_s28 = int_to_ptr.vmem [resolvable:$true] %s499_s28 }
  0x88   : > { %s2898_s4 = sand.u32 1, %s2330_s26   ;;  %s2215_s6 = scalar_lea.vmem %s500_s28, 128 }
  0x89   : > { %s488_s0 = scalar_lea.sflag [#allocation11], %s2898_s4  ;;  %p2216_p3 = scmp.ne.s32.totalorder %s500_s28, %s2215_s6 }
  0x8a   : > { %p2899_p6 = pmov %p2897_p12  ;;  %s2341_s14 = smov [#allocation10]  }
  0x8b   : > { %s2220_s1 = sshll.u32 %s2341_s14, 4  ;;  %s2221_s1 = int_to_ptr.vmem [resolvable:$false] %s2220_s1 }
  0x8c   : > { %p2218_p1 = pnand %p2216_p3, %p2899_p6  ;;  %s2222_s11 = scalar_lea.vmem %s2221_s1, 256 }
  0x8d   : > { %p2223_p10 = scmp.lt.s32.totalorder %s500_s28, %s2221_s1  ;;  %p2224_p9 = scmp.lt.s32.totalorder %s2222_s11, %s2215_s6 }
  0x8e   : > { %p2219_p12 = pneg %p2218_p1 }
  0x8f   : > { %p2225_p0 = por %p2224_p9, %p2223_p10 }
  0x91   : > { %p2226_p2 = pnand %p2225_p0, %p2219_p12 }
  0x93   : > { %2229 = shalt.err (!%p2226_p2)
}
  0x94   : > { %1916 = dma.hbm_to_vmem [thread:$0]  (!%p2525_p13), %s497_s12, 128, %s500_s28, %s488_s0  }
  0x95   : > { %508 = sbr.rel (%p2463_p8) target bundleno = 2654 (0xa5e), region = 68  ;;  %s2606_s30 = sand.u32 (!%p2463_p8), 1, %s2314_s22  }
  0x96   : > { %s2609_s23 = sshll.u32 (!%p2463_p8), %s2606_s30, 2  ;;  %s511_s16 = scalar_lea.sflag (!%p2463_p8), [#allocation5], %s2606_s30 }
  0x97   : > { %s514_s21 = scalar_lea.vmem (!%p2463_p8), [#allocation4], %s2609_s23 }
  0x9a   : > { %2281 = dma.done.wait (%p2453_p4), %s511_s16, 64  }
  0x9b   : > { %2283 = vsyncadd (%p2453_p4), %s511_s16, 4294967232  ;;  %s519_s13 = sand.u32 1, %s2444_s27   ;;  %s523_s15 = scalar_lea.vmem [#allocation7], %s2609_s23 }
  0x9c   : > { %s520_s20 = scalar_lea.sflag [#allocation8], %s519_s13 }
  0x9d   : > { %2285 = dma.done.wait (%p2453_p4), %s520_s20, 128  }
  0x9e   : > { %2287 = vsyncadd (%p2453_p4), %s520_s20, 4294967168  ;;  %s1699_s18 = sshll.u32 %s2606_s30, 3  ;;  %s532_s17 = scalar_lea.vmem [#allocation9], %s2609_s23 }
  0x9f   : > { %s538_s19 = scalar_lea.sflag [#allocation11], %s519_s13  ;;  %s2627_s12 = scalar_lea.vmem [#allocation10], %s1699_s18 }
  0xa0   : > { %2289 = dma.done.wait (%p2453_p4), %s538_s19, 128  }
  0xa1   : > { %2291 = vsyncadd (%p2453_p4), %s538_s19, 4294967168  ;;  %p2900_p8 = scmp.eq.s32.totalorder %s2444_s27, 0 }
  0xa3   : > { %2293 = dma.done.wait (%p2900_p8), [#allocation11], 256   ;;  %p2901_p13 = pmov %p2900_p8 }
  0xa4   : > { %p2902_p5 = pmov %p2900_p8 }
  0xa5   : > { %2295 = vsyncadd (%p2901_p13), [#allocation11], 4294967040 }
  0xa6   : > { %2297 = dma.done.wait (%p2902_p5), [#allocation14], 512   ;;  %p2903_p11 = pmov %p2902_p5 }
  0xa7   : > { %p2904_p3 = pmov %p2902_p5 }
  0xa8   : > { %2299 = vsyncadd (%p2903_p11), [#allocation14], 4294966784 }
  0xa9   : > { %2301 = dma.done.wait (%p2904_p3), [#allocation17], 16   ;;  %p2905_p6 = pmov %p2904_p3 }
  0xaa   : > { %v2342_v0 = vmov 0.0   ;;  %vm2343_vm0 = vmmov 0   ;;  %v1990_v1 = vld [vmem:[#allocation13 + $0x8] sm:$0xff]   ;;  %v1991_v2 = vld [vmem:[#allocation13] sm:$0xff]   ;;  %v618_v3 = vld [vmem:[%s523_s15] sm:$0xf] }
  0xab   : > { %2303 = vsyncadd (%p2905_p6), [#allocation17], 4294967280  ;;  %1769 = vmatprep.subr.bf16.mxu0 %v2342_v0  ;;  %1773 = vmatprep.mubr.msk.bf16.mxu0 %vm2343_vm0, %v2342_v0  ;;  %vm643_vm1 = vcmask 261120   ;;  %v1992_v4 = vld [vmem:[#allocation12 + $0x8] sm:$0xff]   ;;  %v1993_v5 = vld [vmem:[#allocation12] sm:$0xff]   ;;  %vm754_vm2 = vcmask 257024  }
  0xac   : > { %1777 = vmatprep.subr.bf16.mxu1 %v2342_v0  ;;  %1781 = vmatprep.mubr.msk.bf16.mxu1 %vm2343_vm0, %v2342_v0  ;;  %v758_v6 = vld [vmem:[%s514_s21] sm:$0xf]  ;;  %v1994_v7 = vld [vmem:[#allocation15 + $0x8] sm:$0xff]   ;;  %v1995_v8 = vld [vmem:[#allocation15] sm:$0xff]   ;;  %vm833_vm3 = vcmask 64512   ;;  %s2344_s4 = smov 120  }
  0xad   : > { %1770 = vmatpush3.bf16.msra.mxu0 %v1990_v1  ;;  %1778 = vmatpush3.bf16.msra.mxu1 %v1994_v7  ;;  %v619_v9 = vld [vmem:[%s532_s17] sm:$0xf]  ;;  %v1705_v10 = vld [vmem:[%s2850_s7] ss:$0 sm:$0xff]  ;;  %vm895_vm4 = vcmask 1043456   ;;  %s2345_s0 = smov 112  }
  0xae   : > { %1771 = vmatprep.subr.bf16.mxu0 %v2342_v0  ;;  %1779 = vmatprep.subr.bf16.mxu1 %v2342_v0  ;;  %v1713_v17 = vld [vmem:[%s2848_s5] ss:$0 sm:$0xff]  ;;  %s2346_s23 = smov 104   ;;  %s2906_s15 = sld [smem:[#allocation28_spill]] }
  0xaf   : > { %v1709_v28 = vld [vmem:[#allocation16] ss:$0 sm:$0xff]  ;;  %s612_s24 = scalar_lea.vmem [#allocation18], %s1699_s18  ;;  %s2909_s6 = sld [smem:[#allocation38_spill]] }
  0xb0   : > { %v828_v40 = vld [vmem:[%s2627_s12] sm:$0xff]  ;;  %s2907_s12 = sld [smem:[#allocation37_spill]]  ;;  %s1494_s28 = sshll.u32 %s612_s24, 4  ;;  %s2796_s28 = int_to_ptr.vmem [resolvable:$true] %s1494_s28 }
  0xb1   : > { %1772 = vmatpush3.bf16.msra.mxu0 %v1991_v2  ;;  %1780 = vmatpush3.bf16.msra.mxu1 %v1995_v8  ;;  %vm829_vm5 = vcmp.eq.f32.partialorder %v828_v40, 0.0  ;;  %s1480_s1 = scalar_lea.sflag [#allocation6], %s2606_s30  ;;  %s2230_s18 = scalar_lea.vmem %s2796_s28, 128 }
  0xb2   : > { %1785 = vmatprep.subr.bf16.mxu0 %v2342_v0  ;;  %1793 = vmatprep.subr.bf16.mxu1 %v2342_v0  ;;  %v2701_v41 = vsel %vm829_vm5, -1e+30, %v2342_v0  ;;  %p2231_p4 = scmp.ne.s32.totalorder %s2796_s28, %s2230_s18  ;;  %s2347_s11 = smov [#allocation18]  }
  0xb4   : > { %1774 = vmatmul.mubr.msk.bf16.vlgmr.msra.gmra.mxu0 %vm643_vm1, %v618_v3  ;;  %1782 = vmatmul.mubr.msk.bf16.vlgmr.msra.gmra.mxu1 %vm643_vm1, %v619_v9  ;;  %s1733_s29 = sshll.u32 %s2906_s15, 7  ;;  %p2232_p1 = pnand %p2231_p4, %p2510_p7 }
  0xb5   : > { %1786 = vmatpush3.bf16.msra.mxu0 %v1992_v4  ;;  %1789 = vmatprep.mubr.msk.bf16.mxu0 %vm2343_vm0, %v2342_v0  ;;  %s2794_s14 = scalar_lea.hbm %s2909_s6, %s1733_s29 }
  0xb6   : > { %1787 = vmatprep.subr.bf16.mxu0 %v2342_v0  ;;  %1795 = vmatprep.mubr.msk.bf16.mxu1 %vm2343_vm0, %v2342_v0  ;;  %p2233_p12 = pneg %p2232_p1 }
  0xb9   : > { %1788 = vmatpush3.bf16.msra.mxu0 %v1993_v5 }
  0xba   : > { %1799 = vmatprep.subr.bf16.mxu0 %v2342_v0 }
  0xbc   : > { %1790 = vmatmul.mubr.msk.bf16.vlgmr.msra.gmra.mxu0 %vm643_vm1, %v758_v6  ;;  %v1059_v6 = vld [vmem:[%s2853_s10 + $0x4] sm:$0xf] }
  0xbd   : > { %1801 = vmatprep.mubr.msk.bf16.mxu0 %vm2343_vm0, %v2342_v0  ;;  %v1064_v7 = vsel %vm895_vm4, %v1059_v6, 0 }
 0x174   : > { %v681_v11 = vpop.f32.mrf.mxu0  ;;  %v747_v29 = vpop.f32.mrf.mxu1 }
 0x175   : > { %v682_v12 = vadd.f32 %v1705_v10, %v681_v11  ;;  %v748_v30 = vadd.f32 %v1709_v28, %v747_v29 }
 0x176   : > { %v1775_v13 = vpop.f32.mrf.mxu0  ;;  %v1783_v31 = vpop.f32.mrf.mxu1 }
 0x177   : > { %v753_v14 = vpack.c.bf16 %v682_v12, %v682_v12  ;;  %v756_v32 = vpack.c.bf16 %v748_v30, %v748_v30  ;;  %v940_v12 = vld [vmem:[%s2853_s10] sm:$0xf] }
 0x178   : > { %v684_v15 = vpop.f32.mrf.mxu0  ;;  %v750_v33 = vpop.f32.mrf.mxu1 }
 0x179   : > { %755 = vst.msk [vmem:[#allocation2] sm:$0xf] %vm754_vm2, %v753_v14  ;;  %757 = vst.msk [vmem:[#allocation3] sm:$0xf] %vm754_vm2, %v756_v32  ;;  %v1110_v15 = vsel %vm895_vm4, %v940_v12, 0 }
 0x17a   : > { %v1776_v16 = vpop.f32.mrf.mxu0  ;;  %v1784_v34 = vpop.f32.mrf.mxu1 }
 0x17c   : > { %v820_v18 = vpop.f32.mrf.mxu0 }
 0x17d   : > { %v821_v19 = vadd.f32 %v1713_v17, %v820_v18 }
 0x17e   : > { %v1791_v20 = vpop.f32.mrf.mxu0 }
 0x17f   : > { %v826_v23 = vmul.f32 0.35355338, %v821_v19 }
 0x180   : > { %v831_v21 = vld [vmem:[#allocation2] sm:$0xf]  ;;  %v823_v22 = vpop.f32.mrf.mxu0  ;;  %v832_v35 = vld [vmem:[#allocation3] sm:$0xf] }
 0x181   : > { %v838_v24 = vsel %vm833_vm3, %v831_v21, 0  ;;  %v2678_v25 = vcombine.low %v831_v21, %v831_v21  ;;  %v2683_v27 = vpack.c.bf16 %v826_v23, %v826_v23  ;;  %v897_v36 = vsel %vm895_vm4, %v832_v35, 0 }
 0x182   : > { %1794 = vmatpush3.bf16.xpose.msra.mxu1 %v838_v24  ;;  %v1792_v26 = vpop.f32.mrf.mxu0  ;;  %1800 = vmatpush3.bf16.msra.mxu0 %v897_v36  ;;  %v2708_v59 = vcombine.low %v832_v35, %v832_v35 }
 0x183   : > { %947 = vrot.lane.b32.xlu0 %v2678_v25, %s2344_s4  ;;  %1805 = vmatprep.subr.bf16.mxu1 %v2342_v0 }
 0x184   : > { %1811 = vmatprep.subr.bf16.mxu0 %v2342_v0 }
 0x187   : > { %942 = vrot.lane.b32.xlu0 %v2683_v27, %s2344_s4 }
 0x189   : > { %1796 = vmatmul.mubr.msk.bf16.vlgmr.msra.gmra.mxu1 %vm833_vm3, %v2683_v27 }
 0x18a   : > { %1807 = vmatprep.mubr.msk.bf16.mxu1 %vm2343_vm0, %v2342_v0 }
 0x1f5   : > { %v948_v37 = vpop.permute.xlu0 %947 }
 0x1f6   : > { %v953_v38 = vsel %vm833_vm3, %v948_v37, 0 }
 0x1f7   : > { %1806 = vmatpush3.bf16.xpose.msra.mxu1 %v953_v38 }
 0x1f8   : > { %1817 = vmatprep.subr.bf16.mxu1 %v2342_v0 }
 0x1f9   : > { %v943_v39 = vpop.permute.xlu0 %942 }
 0x1fe   : > { %1808 = vmatmul.mubr.msk.bf16.vlgmr.msra.gmra.mxu1 %vm833_vm3, %v943_v39 }
 0x1ff   : > { %1819 = vmatprep.mubr.msk.bf16.mxu1 %vm2343_vm0, %v2342_v0  ;;  %1818 = vmatpush3.bf16.msra.mxu1 %v1064_v7 }
 0x200   : > { %1829 = vmatprep.subr.bf16.mxu1 %v2342_v0 }
 0x249   : > { %v874_v42 = vpop.f32.mrf.mxu1 }
 0x24a   : > { %v875_v43 = vadd.f32 %v874_v42, %v2701_v41 }
 0x24b   : > { %v1797_v44 = vpop.f32.mrf.mxu1 }
 0x24c   : > { %v880_v45 = vsel %vm833_vm3, %v875_v43, -inf }
 0x24d   : > { %881 = vmax.xlane.f32.xlu1 %v880_v45  ;;  %v877_v46 = vpop.f32.mrf.mxu1 }
 0x24f   : > { %v1798_v47 = vpop.f32.mrf.mxu1 }
 0x2be   : > { %v989_v48 = vpop.f32.mrf.mxu1 }
 0x2bf   : > { %v990_v49 = vadd.f32 %v989_v48, %v2701_v41 }
 0x2c0   : > { %v1809_v50 = vpop.f32.mrf.mxu1 }
 0x2c1   : > { %v995_v51 = vsel %vm833_vm3, %v990_v49, -inf }
 0x2c2   : > { %996 = vmax.xlane.f32.xlu1 %v995_v51  ;;  %v992_v52 = vpop.f32.mrf.mxu1 }
 0x2c4   : > { %v1810_v53 = vpop.f32.mrf.mxu1 }
 0x2d6   : > { %v882_v54 = vpop.xlane.xlu1 %881 }
 0x2d7   : > { %v883_v55 = vsub.f32 %v875_v43, %v882_v54 }
 0x2d9   : > { %v884_v56 = vmul.f32 1.442695, %v883_v55 }
 0x2db   : > { %1998 = vpow2.f32 %v884_v56 }
 0x2e8   : > { %v1999_v57 = vpop.eup %1998 }
 0x2e9   : > { %v886_v58 = vsel %vm833_vm3, %v1999_v57, 0.0 }
 0x2ea   : > { %887 = vadd.xlane.f32.xlu0 %v886_v58 }
 0x300   : > { %1214 = vrot.lane.b32.xlu0 %v2708_v59, %s2345_s0 }
 0x34b   : > { %v997_v60 = vpop.xlane.xlu1 %996 }
 0x34c   : > { %v998_v61 = vsub.f32 %v990_v49, %v997_v60 }
 0x34e   : > { %v999_v62 = vmul.f32 1.442695, %v998_v61 }
 0x350   : > { %2000 = vpow2.f32 %v999_v62 }
 0x35d   : > { %v2001_v63 = vpop.eup %2000 }
 0x35e   : > { %v1001_v1 = vsel %vm833_vm3, %v2001_v63, 0.0 }
 0x35f   : > { %1002 = vadd.xlane.f32.xlu1 %v1001_v1 }
 0x370   : > { %1010 = vrot.lane.b32.xlu1 %v2708_v59, %s2344_s4 }
 0x373   : > { %v888_v2 = vpop.xlane.xlu0 %887 }
 0x374   : > { %2002 = vrcp.f32 %v888_v2  ;;  %1154 = vrot.lane.b32.xlu1 %v2678_v25, %s2345_s0 }
 0x377   : > { %v1215_v16 = vpop.permute.xlu0 %1214 }
 0x378   : > { %1152 = vrot.lane.b32.xlu1 %v2683_v27, %s2345_s0  ;;  %v1220_v20 = vsel %vm895_vm4, %v1215_v16, 0  ;;  %v1422_v16 = vld [vmem:[%s2853_s10 + $0xc] sm:$0xf] }
 0x381   : > { %v2003_v3 = vpop.eup %2002 }
 0x382   : > { %v890_v4 = vmul.f32 %v2003_v3, %v1999_v57 }
 0x384   : > { %v891_v5 = vpack.c.bf16 %v890_v4, %v890_v4 }
 0x386   : > { %1802 = vmatmul.mubr.msk.bf16.vlgmr.msra.gmra.mxu0 %vm833_vm3, %v891_v5 }
 0x387   : > { %1813 = vmatprep.mubr.msk.bf16.mxu0 %vm2343_vm0, %v2342_v0 }
 0x3e8   : > { %v1003_v8 = vpop.xlane.xlu1 %1002 }
 0x3e9   : > { %2004 = vrcp.f32 %v1003_v8 }
 0x3ec   : > { %v1011_v9 = vpop.permute.xlu1 %1010 }
 0x3ed   : > { %v1016_v10 = vsel %vm895_vm4, %v1011_v9, 0 }
 0x3ee   : > { %1812 = vmatpush3.bf16.msra.mxu0 %v1016_v10 }
 0x3ef   : > { %1823 = vmatprep.subr.bf16.mxu0 %v2342_v0 }
 0x3f0   : > { %v1155_v23 = vpop.permute.xlu1 %1154 }
 0x3f1   : > { %v1160_v29 = vsel %vm833_vm3, %v1155_v23, 0 }
 0x3f4   : > { %v1153_v32 = vpop.permute.xlu1 %1152 }
 0x3f6   : > { %v2005_v11 = vpop.eup %2004 }
 0x3f7   : > { %v1005_v13 = vmul.f32 %v2005_v11, %v2001_v63 }
 0x3f9   : > { %v1006_v14 = vpack.c.bf16 %v1005_v13, %v1005_v13 }
 0x3fb   : > { %1814 = vmatmul.mubr.msk.bf16.vlgmr.msra.gmra.mxu0 %vm833_vm3, %v1006_v14 }
 0x3fc   : > { %1824 = vmatpush3.bf16.msra.mxu0 %v1110_v15  ;;  %1825 = vmatprep.mubr.msk.bf16.mxu0 %vm2343_vm0, %v2342_v0 }
 0x3fd   : > { %1835 = vmatprep.subr.bf16.mxu0 %v2342_v0 }
 0x446   : > { %v933_v17 = vpop.f32.mrf.mxu0 }
 0x447   : > { %v939_v18 = vpack.c.bf16 %v933_v17, %v933_v17  ;;  %v1427_v17 = vsel %vm895_vm4, %v1422_v16, 0 }
 0x448   : > { %v1803_v19 = vpop.f32.mrf.mxu0 }
 0x449   : > { %1826 = vmatmul.mubr.msk.bf16.vlgmr.msra.gmra.mxu0 %vm833_vm3, %v939_v18 }
 0x44a   : > { %1836 = vmatpush3.bf16.msra.mxu0 %v1220_v20  ;;  %v936_v21 = vpop.f32.mrf.mxu0  ;;  %1837 = vmatprep.mubr.msk.bf16.mxu0 %vm2343_vm0, %v2342_v0 }
 0x44b   : > { %1847 = vmatprep.subr.bf16.mxu0 %v2342_v0 }
 0x44c   : > { %v1804_v22 = vpop.f32.mrf.mxu0 }
 0x4bb   : > { %v1052_v24 = vpop.f32.mrf.mxu0 }
 0x4bc   : > { %v1058_v26 = vpack.c.bf16 %v1052_v24, %v1052_v24 }
 0x4bd   : > { %v1815_v28 = vpop.f32.mrf.mxu0 }
 0x4be   : > { %1820 = vmatmul.mubr.msk.bf16.vlgmr.msra.gmra.mxu1 %vm833_vm3, %v1058_v26 }
 0x4bf   : > { %1830 = vmatpush3.bf16.xpose.msra.mxu1 %v1160_v29  ;;  %v1055_v30 = vpop.f32.mrf.mxu0  ;;  %1831 = vmatprep.mubr.msk.bf16.mxu1 %vm2343_vm0, %v2342_v0 }
 0x4c0   : > { %1841 = vmatprep.subr.bf16.mxu1 %v2342_v0 }
 0x4c1   : > { %v1816_v31 = vpop.f32.mrf.mxu0 }
 0x4c6   : > { %1832 = vmatmul.mubr.msk.bf16.vlgmr.msra.gmra.mxu1 %vm833_vm3, %v1153_v32 }
 0x4c7   : > { %1843 = vmatprep.mubr.msk.bf16.mxu1 %vm2343_vm0, %v2342_v0 }
 0x509   : > { %v2747_v33 = vpop.f32.mrf.mxu0 }
 0x50b   : > { %v1827_v34 = vpop.f32.mrf.mxu0 }
 0x50d   : > { %v1149_v35 = vpop.f32.mrf.mxu0 }
 0x50f   : > { %v1828_v36 = vpop.f32.mrf.mxu0 }
 0x57e   : > { %v1100_v37 = vpop.f32.mrf.mxu1 }
 0x580   : > { %v1821_v38 = vpop.f32.mrf.mxu1 }
 0x582   : > { %v1103_v39 = vpop.f32.mrf.mxu1 }
 0x584   : > { %v1822_v40 = vpop.f32.mrf.mxu1 }
 0x586   : > { %v1196_v42 = vpop.f32.mrf.mxu1 }
 0x587   : > { %v1197_v43 = vadd.f32 %v1196_v42, %v2701_v41 }
 0x588   : > { %v1833_v44 = vpop.f32.mrf.mxu1 }
 0x589   : > { %v1202_v45 = vsel %vm833_vm3, %v1197_v43, -inf }
 0x58a   : > { %1203 = vmax.xlane.f32.xlu1 %v1202_v45  ;;  %v1199_v46 = vpop.f32.mrf.mxu1 }
 0x58c   : > { %v1834_v47 = vpop.f32.mrf.mxu1 }
 0x613   : > { %v1204_v48 = vpop.xlane.xlu1 %1203 }
 0x614   : > { %v1205_v49 = vsub.f32 %v1197_v43, %v1204_v48 }
 0x616   : > { %v1206_v50 = vmul.f32 1.442695, %v1205_v49 }
 0x618   : > { %2006 = vpow2.f32 %v1206_v50 }
 0x625   : > { %v2007_v51 = vpop.eup %2006 }
 0x626   : > { %v1208_v52 = vsel %vm833_vm3, %v2007_v51, 0.0 }
 0x627   : > { %1209 = vadd.xlane.f32.xlu0 %v1208_v52 }
 0x63d   : > { %1313 = vrot.lane.b32.xlu0 %v2678_v25, %s2346_s23 }
 0x641   : > { %1311 = vrot.lane.b32.xlu0 %v2683_v27, %s2346_s23  ;;  %v1263_v27 = vld [vmem:[%s2853_s10 + $0x8] sm:$0xf] }
 0x642   : > { %v1268_v60 = vsel %vm895_vm4, %v1263_v27, 0 }
 0x643   : > { %1842 = vmatpush3.bf16.msra.mxu1 %v1268_v60 }
 0x644   : > { %1853 = vmatprep.subr.bf16.mxu1 %v2342_v0 }
 0x6b0   : > { %v1210_v53 = vpop.xlane.xlu0 %1209 }
 0x6b1   : > { %2008 = vrcp.f32 %v1210_v53 }
 0x6b4   : > { %v1314_v56 = vpop.permute.xlu0 %1313 }
 0x6b5   : > { %v1319_v58 = vsel %vm833_vm3, %v1314_v56, 0 }
 0x6b8   : > { %v1312_v25 = vpop.permute.xlu0 %1311 }
 0x6be   : > { %v2009_v54 = vpop.eup %2008 }
 0x6bf   : > { %v1212_v55 = vmul.f32 %v2009_v54, %v2007_v51 }
 0x6c1   : > { %v1213_v57 = vpack.c.bf16 %v1212_v55, %v1212_v55 }
 0x6c3   : > { %1838 = vmatmul.mubr.msk.bf16.vlgmr.msra.gmra.mxu0 %vm833_vm3, %v1213_v57 }
 0x6c4   : > { %1848 = vmatpush3.bf16.xpose.msra.mxu0 %v1319_v58  ;;  %1849 = vmatprep.mubr.msk.bf16.mxu0 %vm2343_vm0, %v2342_v0 }
 0x6c5   : > { %1859 = vmatprep.subr.bf16.mxu0 %v2342_v0 }
 0x6cb   : > { %1850 = vmatmul.mubr.msk.bf16.vlgmr.msra.gmra.mxu0 %vm833_vm3, %v1312_v25 }
 0x6cc   : > { %1861 = vmatprep.mubr.msk.bf16.mxu0 %vm2343_vm0, %v2342_v0  ;;  %1860 = vmatpush3.bf16.msra.mxu0 %v1427_v17 }
 0x783   : > { %v1256_v61 = vpop.f32.mrf.mxu0 }
 0x784   : > { %v1262_v62 = vpack.c.bf16 %v1256_v61, %v1256_v61 }
 0x785   : > { %v1839_v63 = vpop.f32.mrf.mxu0 }
 0x786   : > { %1844 = vmatmul.mubr.msk.bf16.vlgmr.msra.gmra.mxu1 %vm833_vm3, %v1262_v62 }
 0x787   : > { %v1259_v1 = vpop.f32.mrf.mxu0  ;;  %1855 = vmatprep.mubr.msk.bf16.mxu1 %vm2343_vm0, %v2342_v0  ;;  %v1147_v0 = vadd.f32 %v2747_v33, %v1100_v37  ;;  %v1731_v33 = vld [vmem:[%s2907_s12] ss:$0 sm:$0xff] }
 0x789   : > { %v1840_v2 = vpop.f32.mrf.mxu0 }
 0x78b   : > { %v1355_v3 = vpop.f32.mrf.mxu0 }
 0x78c   : > { %v1356_v4 = vadd.f32 %v1355_v3, %v2701_v41 }
 0x78d   : > { %v1851_v5 = vpop.f32.mrf.mxu0 }
 0x78e   : > { %v1361_v6 = vsel %vm833_vm3, %v1356_v4, -inf }
 0x78f   : > { %1362 = vmax.xlane.f32.xlu0 %v1361_v6  ;;  %v1358_v7 = vpop.f32.mrf.mxu0 }
 0x791   : > { %v1852_v8 = vpop.f32.mrf.mxu0 }
 0x818   : > { %v1363_v9 = vpop.xlane.xlu0 %1362 }
 0x819   : > { %v1364_v10 = vsub.f32 %v1356_v4, %v1363_v9 }
 0x81b   : > { %v1365_v11 = vmul.f32 1.442695, %v1364_v10 }
 0x81d   : > { %2010 = vpow2.f32 %v1365_v11 }
 0x82a   : > { %v2011_v12 = vpop.eup %2010 }
 0x82b   : > { %v1367_v13 = vsel %vm833_vm3, %v2011_v12, 0.0 }
 0x82c   : > { %1368 = vadd.xlane.f32.xlu1 %v1367_v13 }
 0x83d   : > { %1373 = vrot.lane.b32.xlu1 %v2708_v59, %s2346_s23  ;;  %s2234_s23 = sshll.u32 %s2347_s11, 4  ;;  %s2235_s23 = int_to_ptr.vmem [resolvable:$false] %s2234_s23 }
 0x83e   : > { %s2236_s16 = scalar_lea.vmem %s2235_s23, 256  ;;  %p2237_p10 = scmp.lt.s32.totalorder %s2796_s28, %s2235_s23 }
 0x83f   : > { %p2238_p9 = scmp.lt.s32.totalorder %s2236_s16, %s2230_s18 }
 0x841   : > { %p2239_p0 = por %p2238_p9, %p2237_p10 }
 0x843   : > { %p2240_p2 = pnand %p2239_p0, %p2233_p12 }
 0x846   : > { %v1304_v41 = vpop.f32.mrf.mxu1 }
 0x847   : > { %v1310_v14 = vadd.f32 %v1304_v41, %v1147_v0 }
 0x848   : > { %v1845_v15 = vpop.f32.mrf.mxu1 }
 0x84a   : > { %v1307_v18 = vpop.f32.mrf.mxu1 }
 0x84c   : > { %v1846_v19 = vpop.f32.mrf.mxu1 }
 0x8b5   : > { %v1369_v20 = vpop.xlane.xlu1 %1368 }
 0x8b6   : > { %2012 = vrcp.f32 %v1369_v20 }
 0x8b9   : > { %v1374_v21 = vpop.permute.xlu1 %1373 }
 0x8ba   : > { %v1379_v59 = vsel %vm895_vm4, %v1374_v21, 0 }
 0x8bb   : > { %1854 = vmatpush3.bf16.msra.mxu1 %v1379_v59 }
 0x8c3   : > { %v2013_v22 = vpop.eup %2012 }
 0x8c4   : > { %v1371_v23 = vmul.f32 %v2013_v22, %v2011_v12 }
 0x8c6   : > { %v1372_v24 = vpack.c.bf16 %v1371_v23, %v1371_v23 }
 0x8c8   : > { %1856 = vmatmul.mubr.msk.bf16.vlgmr.msra.gmra.mxu1 %vm833_vm3, %v1372_v24 }
 0x988   : > { %v1415_v26 = vpop.f32.mrf.mxu1 }
 0x989   : > { %v1421_v28 = vpack.c.bf16 %v1415_v26, %v1415_v26 }
 0x98a   : > { %v1857_v29 = vpop.f32.mrf.mxu1 }
 0x98b   : > { %1862 = vmatmul.mubr.msk.bf16.vlgmr.msra.gmra.mxu0 %vm833_vm3, %v1421_v28 }
 0x98c   : > { %v1418_v30 = vpop.f32.mrf.mxu1 }
 0x98e   : > { %v1858_v31 = vpop.f32.mrf.mxu1 }
 0xa4b   : > { %v1463_v32 = vpop.f32.mrf.mxu0 }
 0xa4c   : > { %v1469_v34 = vadd.f32 %v1463_v32, %v1310_v14 }
 0xa4d   : > { %v1863_v35 = vpop.f32.mrf.mxu0 }
 0xa4e   : > { %v1477_v36 = vadd.f32 %v1731_v33, %v1469_v34 }
 0xa4f   : > { %v1466_v37 = vpop.f32.mrf.mxu0 }
 0xa50   : > { %1478 = vst.msk [vmem:[%s612_s24] sm:$0xff] %vm643_vm1, %v1477_v36 }
 0xa51   : > { %v1864_v38 = vpop.f32.mrf.mxu0 }
 0xa52   : > { %2243 = shalt.err (!%p2240_p2)
}
 0xa53   : > { %s2244_s21 = scalar_lea.hbm %s2794_s14, 128  ;;  %s2248_s20 = scalar_lea.hbm %s2909_s6, 256 }
 0xa54   : > { %p2245_p8 = scmp.ne.s32.totalorder %s2794_s14, %s2244_s21  ;;  %p2249_p11 = scmp.lt.s32.totalorder %s2794_s14, %s2909_s6 }
 0xa55   : > { %p2250_p3 = scmp.lt.s32.totalorder %s2248_s20, %s2244_s21 }
 0xa56   : > { %p2246_p13 = pnand %p2245_p8, %p2510_p7 }
 0xa57   : > { %p2251_p6 = por %p2250_p3, %p2249_p11 }
 0xa58   : > { %p2247_p5 = pneg %p2246_p13 }
 0xa5a   : > { %p2252_p4 = pnand %p2251_p6, %p2247_p5 }
 0xa5c   : > { %2255 = shalt.err (!%p2252_p4)
}
 0xa5d   : > { %1889 = dma.vmem_to_hbm [thread:$0]  (%p2510_p7), %s2796_s28, 128, %s2794_s14, %s1480_s1  }
 0xa5e PF: > { %s2910_s19 = sld [smem:[#allocation26_spill]]  ;;  %p2913_p12 = scmp.ge.s32.totalorder %s2330_s26, 2 }
 0xa5f   : > { %s2911_s12 = sld [smem:[#allocation29_spill]] }
 0xa64   : > { %s1506_s29 = sand.u32 1, %s2910_s19  }
 0xa65   : > { %p2912_p1 = scmp.ne.s32.totalorder %s2911_s12, 0  ;;  %s1507_s24 = scalar_lea.sflag [#allocation6], %s1506_s29 }
 0xa67   : > { %p1918_p10 = pnand %p2913_p12, %p2912_p1 }
 0xa69   : > { %p1919_p9 = pneg %p1918_p10 }
 0xa6b   : > { %2305 = dma.done.wait (%p1919_p9), %s1507_s24, 128  }
 0xa6c   : > { %2307 = vsyncadd (%p1919_p9), %s1507_s24, 4294967168  ;;  %s36_s26 = sadd.s32 1, %s2330_s26   ;;  %s2914_s27 = sld [smem:[#allocation27_spill]] }
 0xa6d   : > { %p33_p0 = scmp.ge.s32.totalorder %s36_s26, 4   ;;  %s2915_s23 = sld [smem:[#allocation32_spill]] }
 0xa6e   : > { %s2916_s28 = sld [smem:[#allocation30_spill]]  ;;  %s2917_s21 = smov %s2314_s22 }
 0xa6f   : > { %s2919_s24 = smov %s2326_s25 }
 0xa70   :  { %35 = sbr.rel (!%p33_p0) target bundleno = 19 (0x13), region = 170 }
 0xa72   : > { %s2918_s22 = smov %s2914_s27 }
 0xa74   : > { %s2920_s25 = smov %s2916_s28 }
 0xa75   :  { %1512 = vsyncpa [#allocation5], 1 }
 0xa76   :  { %1514 = vsyncpa [#allocation5 + $0x1], 1 }
 0xa77   :  { %1515 = vsyncpa [#allocation8], 1 }
 0xa78   :  { %1517 = vsyncpa [#allocation8 + $0x1], 1 }
 0xa79   :  { %1518 = vsyncpa [#allocation11], 1 }
 0xa7a   :  { %1520 = vsyncpa [#allocation11 + $0x1], 1 }
 0xa7b   :  { %1521 = vsyncpa [#allocation14], 1 }
 0xa7c   :  { %1522 = vsyncpa [#allocation17], 1 }
 0xa7d   :  { %1523 = vsyncpa [#allocation6], 1 }
 0xa7e   :  { %1525 = vsyncpa [#allocation6 + $0x1], 1 }

</bundles_post_ra>
